<compile_context>
chip_gen: v7x
topology: tpu7x:2x2x1
jax: 0.10.0
libtpu: 0.0.40
codegen_flags: <defaults>
</compile_context>

<pallas_src>
import jax
import jax.numpy as jnp
from jax.experimental import pallas as pl
from jax.experimental.pallas import tpu as pltpu


def _quantize_kernel(step_ref, x_ref, o_ref):
    # Pure VPU elementwise hot path.  Compute in f32, store in the input dtype.
    s = step_ref[0]                                    # f32 scalar from SMEM
    xf = x_ref[...].astype(jnp.float32)
    o_ref[...] = (jnp.round(xf / s) * s).astype(o_ref.dtype)


def _plain_quantize(x, step):
    # XLA fallback with identical (f32-accurate) semantics to the kernel.
    s = jnp.float32(step)
    return (jnp.round(x.astype(jnp.float32) / s) * s).astype(x.dtype)


_MIN_PALLAS_ELEMS = 64 * 1024                 # below this, fused XLA wins
_LANE_WIDTHS = (8192, 4096, 2048, 1024, 512, 256, 128)


def _round_up(n, m):
    return -(-n // m) * m


def _tpu_tuning():
    """Return (target_block_bytes, vmem_limit_bytes or None, parallel TC count)."""
    try:
        kind = jax.devices()[0].device_kind.lower()
    except Exception:  # pragma: no cover - defensive
        kind = ""
    if "v7" in kind:
        # 3.2 TB/s HBM: 8 MiB blocks keep per-step overhead <5%.  The
        # double-buffered in+out working set (2 spaces x 2 bufs x 8 MiB) is
        # 32 MiB == the scoped default, so raise the limit explicitly.
        return 8 * 1024 * 1024, 40 << 20, 2
    if "v6" in kind:
        # 4 MiB blocks -> 16 MiB working set, inside the 32 MiB scoped default.
        return 4 * 1024 * 1024, None, 1
    # v5e (~820 GB/s) / unknown: 2 MiB blocks already keep step overhead <7%
    # and the 8 MiB working set stays well inside the 16 MiB scoped default.
    return 2 * 1024 * 1024, None, 1


def input_quantizer(x, step, *, min_pallas_elems=_MIN_PALLAS_ELEMS,
                    donate_input=False):
    """JAX/Pallas equivalent of InputQuantizer(step)(x) for a plain tensor.

    donate_input=True aliases the input buffer as the output (only safe when
    the caller does not use x afterwards).
    """
    total = x.size
    if total == 0:
        return x
    if total < min_pallas_elems or total % 128 != 0:
        # Tiny or non-lane-aligned tensors: plain XLA.  Avoids custom-call
        # launch overhead and the pad/slice HBM copies a misaligned size needs.
        return _plain_quantize(x, step)

    block_bytes, vmem_limit, num_cores = _tpu_tuning()
    itemsize = x.dtype.itemsize
    # dtype-native sublane multiple: 8 for f32, 16 for bf16, 32 for int8/fp8,
    # so packed dtypes get whole native (sub,128) tiles and unmasked stores.
    sub = max(8, 32 // itemsize)

    # Widest lane-dense slab that divides the tensor and still leaves at least
    # one native sublane group of rows.
    lanes = None
    for c in _LANE_WIDTHS:
        if total % c == 0 and total // c >= sub:
            lanes = c
            break
    if lanes is None:
        return _plain_quantize(x, step)

    orig_shape = x.shape
    rows = total // lanes
    x2d = x.reshape(rows, lanes)               # contiguous reshape: no copy

    # Tile rows: dtype-aware sublane multiple, sized for the per-generation
    # target block bytes, never larger than the (rounded-up) slab.
    tr = max(sub, (block_bytes // (lanes * itemsize)) // sub * sub)
    tr = min(tr, _round_up(rows, sub))
    if num_cores >= 2 and rows >= 2 * sub:
        # Megacore (v7x) only: force >= 2 near-equal blocks so the "parallel"
        # grid axis can shard across both TensorCores without load imbalance.
        half = _round_up(-(-rows // 2), sub)
        tr = min(tr, half)
    grid = (pl.cdiv(rows, tr),)                # ragged last block is masked

    step_arr = jnp.full((1,), step, jnp.float32)

    cp_kwargs = dict(dimension_semantics=("parallel",))
    if vmem_limit is not None:
        cp_kwargs["vmem_limit_bytes"] = vmem_limit

    out2d = pl.pallas_call(
        _quantize_kernel,
        out_shape=jax.ShapeDtypeStruct((rows, lanes), x.dtype),
        grid_spec=pltpu.PrefetchScalarGridSpec(
            num_scalar_prefetch=0,
            grid=grid,
            in_specs=[pl.BlockSpec(memory_space=pltpu.MemorySpace.SMEM),
                      pl.BlockSpec((tr, lanes), lambda i: (i, 0))],
            out_specs=pl.BlockSpec((tr, lanes), lambda i: (i, 0)),
        ),
        compiler_params=pltpu.CompilerParams(**cp_kwargs),
        input_output_aliases=({1: 0} if donate_input else {}),
    )(step_arr, x2d)
    return out2d.reshape(orig_shape)


# --- container-type forwarding, mirroring the PyTorch module ----------------

def input_quantizer_abstract(vmin, vmax, loss, step):
    """AbstractTensor path: quantize vmin and vmax independently."""
    return input_quantizer(vmin, step), input_quantizer(vmax, step), loss


def input_quantizer_multisample(k, data, loss, step):
    """MultiSampleTensor path: apply to the packed (K*N, C, H, W) data."""
    return k, input_quantizer(data, step), loss

# TODO(synk): RoundFn's straight-through backward (identity gradient) is not
# implemented here; only the forward pass is provided (wrap in jax.custom_vjp
# for training).


if __name__ == "__main__":
    key = jax.random.PRNGKey(0)
    step = 0.1  # InputQuantizer(step=0.1)

    # 1) Small NCHW tensor (module-typical shape). Force the Pallas path.
    x = jax.random.uniform(key, (2, 4, 16, 16), dtype=jnp.float32)
    y = jax.block_until_ready(input_quantizer(x, step, min_pallas_elems=0))
    y_ref = _plain_quantize(x, step)
    assert y.shape == x.shape and y.dtype == x.dtype
    assert float(jnp.max(jnp.abs(y - y_ref))) < 1e-6

    # 2) Larger activation tensor: default path (wide lanes, possibly a
    #    2-way megacore split on v7x).
    xl = jax.random.uniform(jax.random.PRNGKey(1), (8, 4, 64, 64),
                            dtype=jnp.float32)
    yl = jax.block_until_ready(input_quantizer(xl, step))
    assert float(jnp.max(jnp.abs(yl - _plain_quantize(xl, step)))) < 1e-6

    # 3) bf16 input stays bf16 end-to-end (f32-accurate quantization inside;
    #    power-of-two step -> exact check against the matching XLA reference).
    xb = jax.random.uniform(jax.random.PRNGKey(2), (8, 4, 64, 64),
                            dtype=jnp.bfloat16)
    yb = jax.block_until_ready(input_quantizer(xb, 0.125, min_pallas_elems=0))
    yb_ref = _plain_quantize(xb, 0.125)
    assert yb.dtype == jnp.bfloat16
    assert bool(jnp.all(yb == yb_ref))

    # 4) Non-128-aligned size: plain-XLA fallback path (no pad/slice copies).
    xo = jax.random.uniform(jax.random.PRNGKey(3), (3, 5, 7, 9),
                            dtype=jnp.float32)
    yo = jax.block_until_ready(input_quantizer(xo, step))
    assert float(jnp.max(jnp.abs(yo - _plain_quantize(xo, step)))) < 1e-6

    # 5) AbstractTensor path (interval arithmetic): elementwise on vmin/vmax.
    eps = 0.05
    vmin = jnp.clip(x - eps, 0.0, 1.0)
    vmax = jnp.clip(x + eps, 0.0, 1.0)
    qmin, qmax, _ = input_quantizer_abstract(vmin, vmax, jnp.zeros(()), step)
    jax.block_until_ready((qmin, qmax))
    assert float(jnp.max(jnp.abs(qmin - _plain_quantize(vmin, step)))) < 1e-6
    assert float(jnp.max(jnp.abs(qmax - _plain_quantize(vmax, step)))) < 1e-6

    # 6) MultiSampleTensor path: data packed as (K*N, C, H, W).
    k, n = 3, 2
    data = jax.random.uniform(jax.random.PRNGKey(4), (k * n, 4, 16, 16),
                              dtype=jnp.float32)
    _, qdata, _ = input_quantizer_multisample(k, data, 0.0, step)
    jax.block_until_ready(qdata)
    assert float(jnp.max(jnp.abs(qdata - _plain_quantize(data, step)))) < 1e-6

    print("KERNEL_OK")
</pallas_src>

<mosaic_0001>
module attributes {stable_mosaic.version = 11 : i64} {
  func.func @_quantize_kernel(%arg0: i32, %arg1: memref<1xf32, #tpu.memory_space<smem>>, %arg2: memref<8x256xf32, #tpu.memory_space<vmem>>, %arg3: memref<8x256xf32, #tpu.memory_space<vmem>>) attributes {dimension_semantics = [#tpu.dimension_semantics<parallel>], iteration_bounds = array<i64: 1>, scalar_prefetch = 0 : i64, scratch_operands = 0 : i64, tpu.core_type = #tpu.core_type<tc>, window_params = [{transform_indices = @transform_0, window_bounds = array<i64: 1>}, {transform_indices = @transform_1, window_bounds = array<i64: 8, 256>}, {transform_indices = @transform_2, window_bounds = array<i64: 8, 256>}]} {
    %c0 = arith.constant 0 : index
    %0 = memref.load %arg1[%c0] : memref<1xf32, #tpu.memory_space<smem>>
    %c0_0 = arith.constant 0 : index
    %c0_1 = arith.constant 0 : index
    %1 = vector.load %arg2[%c0_0, %c0_1] : memref<8x256xf32, #tpu.memory_space<vmem>>, vector<8x256xf32>
    %2 = vector.broadcast %0 : f32 to vector<8x256xf32>
    %3 = arith.divf %1, %2 : vector<8x256xf32>
    %4 = math.roundeven %3 : vector<8x256xf32>
    %5 = vector.broadcast %0 : f32 to vector<8x256xf32>
    %6 = arith.mulf %4, %5 : vector<8x256xf32>
    %c0_2 = arith.constant 0 : index
    %c0_3 = arith.constant 0 : index
    %7 = vector.load %arg3[%c0_2, %c0_3] : memref<8x256xf32, #tpu.memory_space<vmem>>, vector<8x256xf32>
    tpu.vector_store %arg3[%c0_2, %c0_3], %6 {strides = array<i32>} : memref<8x256xf32, #tpu.memory_space<vmem>>, vector<8x256xf32>,
    return
  }
  func.func @transform_0(%arg0: i32) -> i32 {
    %c0_i32 = arith.constant 0 : i32
    %c0_i32_0 = arith.constant 0 : i32
    return %c0_i32 : i32
  }
  func.func @transform_1(%arg0: i32) -> (i32, i32) {
    %c0_i32 = arith.constant 0 : i32
    %c0_i32_0 = arith.constant 0 : i32
    return %arg0, %c0_i32 : i32, i32
  }
  func.func @transform_2(%arg0: i32) -> (i32, i32) {
    %c0_i32 = arith.constant 0 : i32
    %c0_i32_0 = arith.constant 0 : i32
    return %arg0, %c0_i32 : i32, i32
  }
}

</mosaic_0001>

<bundles_post_ra>
// kernel: tpu_custom_call.1
= control target key start
LH: loop header
LB: loop body
LE: loop exit
PB: predicated region body
PF: predicated region fallthrough
CT: control target
= control target key end

     0   :  { %8 = vsyncpa [#allocation4], 0  ;;  %s151_s0 = inlined_call_operand.<no memory space> [shape: f32[1], index: 0, kind: input, shape index: {}]   ;;  %s152_s1 = inlined_call_operand.hbm [shape: f32[8,256], index: 1, kind: input, shape index: {}]   ;;  %s153_s2 = inlined_call_operand.hbm [shape: f32[8,256], index: 2, kind: output, shape index: {}]  }
   0x1   :  { %9 = vsyncpa [#allocation5], 0  ;;  %s107_s9 = smov [#allocation3]   ;;  %s59_s13 = scalar_lea.hbm %s152_s1, 256 }
   0x2   :  { %s18_s10 = sshll.u32 %s107_s9, 4  ;;  %p60_p0 = scmp.ne.s32.totalorder %s152_s1, %s59_s13  ;;  %s19_s10 = int_to_ptr.vmem [resolvable:$true] %s18_s10 }
   0x3   :  { %p63_p1 = scmp.lt.u32.totalorder %s59_s13, %s152_s1 }
   0x5   :  { %p65_p2 = pnand %p63_p1, %p60_p0 }
   0x7   :  { %68 = shalt.err (!%p65_p2)
}
   0x8   :  { %s69_s18 = scalar_lea.vmem %s19_s10, 256  ;;  %p74_p4 = scmp.lt.s32.totalorder %s19_s10, %s19_s10 }
   0x9   :  { %p70_p3 = scmp.ne.s32.totalorder %s19_s10, %s69_s18  ;;  %p75_p5 = scmp.lt.s32.totalorder %s69_s18, %s69_s18 }
   0xb   :  { %p76_p6 = por %p75_p5, %p74_p4 }
   0xd   :  { %p77_p7 = pnand %p76_p6, %p70_p3 }
   0xf   :  { %80 = shalt.err (!%p77_p7)
}
  0x10   :  { %21 = dma.hbm_to_vmem [thread:$0]  %s152_s1, 256, %s19_s10, [#allocation4]  }
  0x11   :  { %103 = dma.done.wait [#allocation4], 256  }
  0x12   :  { %104 = vsyncadd [#allocation4], 4294967040  ;;  %v28_v0 = vstv %s151_s0  ;;  %v26_v1 = vld [vmem:[#allocation3] sm:$0xff]  ;;  %v27_v2 = vld [vmem:[#allocation3 + $0x8] sm:$0xff]  ;;  %s108_s23 = smov [#allocation6]  }
  0x13   :  { %57 = vrcp.f32 %v28_v0  ;;  %s44_s24 = sshll.u32 %s108_s23, 4  ;;  %s45_s24 = int_to_ptr.vmem [resolvable:$true] %s44_s24 }
  0x14   :  { %s81_s1 = scalar_lea.vmem %s45_s24, 256  ;;  %p86_p9 = scmp.lt.s32.totalorder %s45_s24, %s45_s24 }
  0x15   :  { %p82_p8 = scmp.ne.s32.totalorder %s45_s24, %s81_s1  ;;  %p87_p10 = scmp.lt.s32.totalorder %s81_s1, %s81_s1 }
  0x17   :  { %p88_p11 = por %p87_p10, %p86_p9 }
  0x19   :  { %p89_p12 = pnand %p88_p11, %p82_p8 }
  0x1d   :  { %v58_v3 = vpop.eup %57 }
  0x1e   :  { %v30_v4 = vmul.f32 %v58_v3, %v26_v1  ;;  %v31_v5 = vmul.f32 %v58_v3, %v27_v2 }
  0x20   :  { %v53_v6 = vround.rtne.f32 %v30_v4  ;;  %v54_v7 = vround.rtne.f32 %v31_v5 }
  0x22   :  { %v34_v8 = vmul.f32 %v53_v6, %v28_v0  ;;  %v35_v9 = vmul.f32 %v54_v7, %v28_v0 }
  0x24   :  { %36 = vst [vmem:[#allocation6] sm:$0xff] %v34_v8  ;;  %37 = vst [vmem:[#allocation6 + $0x8] sm:$0xff] %v35_v9 }
  0x25   :  { %92 = shalt.err (!%p89_p12)
}
  0x26   :  { %s93_s26 = scalar_lea.hbm %s153_s2, 256 }
  0x27   :  { %p94_p13 = scmp.ne.s32.totalorder %s153_s2, %s93_s26  ;;  %p97_p0 = scmp.lt.u32.totalorder %s93_s26, %s153_s2 }
  0x29   :  { %p99_p1 = pnand %p97_p0, %p94_p13 }
  0x2b   :  { %102 = shalt.err (!%p99_p1)
}
  0x2c   :  { %47 = dma.vmem_to_hbm [thread:$0]  %s45_s24, 256, %s153_s2, [#allocation5]  }
  0x2d   :  { %105 = dma.done.wait [#allocation5], 256  }
  0x2e   :  { %106 = vsyncadd [#allocation5], 4294967040 }
  0x2f   :  { %51 = vsyncpa [#allocation4], 1 }
  0x30   :  { %52 = vsyncpa [#allocation5], 1 }

</bundles_post_ra>
